<compile_context>
chip_gen: v6e
topology: v6e:2x2x1
jax: 0.10.0
libtpu: 0.0.40
codegen_flags: <defaults>
</compile_context>

<pallas_src>
import numpy as np
import jax
import jax.numpy as jnp
from jax.experimental import pallas as pl
from jax.experimental.pallas import tpu as pltpu

BN_EPS = 1e-5
BIAS_FINAL_INIT = 0.0003
WEIGHT_FINAL_INIT = 0.003
_SUBLANE = 8


def _ceil_to(x, m):
    return ((x + m - 1) // m) * m


def _bn_relu(h, gamma, beta):
    # Training-mode BatchNorm1d: batch mean, biased variance, then ReLU.
    mu = jnp.mean(h, axis=0, keepdims=True)
    xc = h - mu                                   # centered once, reused
    var = jnp.mean(xc * xc, axis=0, keepdims=True)
    scale = gamma * jax.lax.rsqrt(var + BN_EPS)   # rsqrt -> EUP slot (free-ish)
    return jnp.maximum(xc * scale + beta, 0.0)


def _slab_offsets(num_inputs, num_actions, h0, h1):
    """Row offsets of each parameter segment inside the packed VMEM slab.

    Every segment starts on a sublane (8-row) boundary so in-kernel static
    slices stay tile-aligned.
    Layout (rows): [w1 | W2_h | W2_a | 6 per-feature vector rows].
    """
    w1_off = 0
    w2h_off = w1_off + _ceil_to(num_inputs, _SUBLANE)
    w2a_off = w2h_off + _ceil_to(h0, _SUBLANE)
    vec_off = w2a_off + _ceil_to(num_actions, _SUBLANE)
    n_rows = vec_off + _SUBLANE                    # 6 vector rows padded to 8
    return (w1_off, w2h_off, w2a_off, vec_off), n_rows


def make_critic_kernel(num_inputs, num_actions, h0, h1, offs):
    w1_off, w2h_off, w2a_off, vec_off = offs

    def kernel(x_ref, a_ref, p_ref, v_ref):
        # Static, sublane-aligned views into the single packed parameter slab.
        w1 = p_ref[w1_off:w1_off + num_inputs, :h0]
        w2h = p_ref[w2h_off:w2h_off + h0, :h1]
        w2a = p_ref[w2a_off:w2a_off + num_actions, :h1]
        g1 = p_ref[vec_off + 0:vec_off + 1, :h0]
        be1 = p_ref[vec_off + 1:vec_off + 2, :h0]
        g2 = p_ref[vec_off + 2:vec_off + 3, :h1]
        be2 = p_ref[vec_off + 3:vec_off + 4, :h1]
        wv = p_ref[vec_off + 4:vec_off + 5, :h1]
        bv = p_ref[vec_off + 5:vec_off + 6, 0:1]

        # --- layer 1: Linear + BN + ReLU ----------------------------------
        # Linear1 bias is dropped: a pre-BN per-feature constant cancels
        # exactly in (h - batch_mean).
        h = jnp.dot(x_ref[...], w1, preferred_element_type=jnp.float32)
        h = _bn_relu(h, g1, be1)

        # --- layer 2: cat([h, actions]) @ W2 as a SPLIT matmul --------------
        #   cat([h, a]) @ W2 == h @ W2_h + a @ W2_a   (no padded concat,
        #   no scratch buffer, MXU K = h0 + A instead of 256).
        h = (jnp.dot(h, w2h, preferred_element_type=jnp.float32)
             + jnp.dot(a_ref[...], w2a, preferred_element_type=jnp.float32))
        h = _bn_relu(h, g2, be2)

        # --- value head (out_features = 1): VPU mul + lane reduce ----------
        v = jnp.sum(h * wv, axis=-1, keepdims=True) + bv
        v_ref[...] = v.astype(v_ref.dtype)

    return kernel


def critic_forward(inputs, actions, params, hidden_size):
    B, num_inputs = inputs.shape
    num_actions = actions.shape[1]
    h0, h1 = hidden_size
    assert B > 1, "training-mode BatchNorm1d requires batch size > 1"

    offs, _ = _slab_offsets(num_inputs, num_actions, h0, h1)
    slab = params["slab"]

    vmem = pl.BlockSpec(memory_space=pltpu.MemorySpace.VMEM)
    cost = pl.CostEstimate(
        flops=2 * B * (num_inputs * h0 + (h0 + num_actions) * h1 + h1),
        transcendentals=h0 + h1,
        bytes_accessed=4 * (inputs.size + actions.size + slab.size + B),
    )

    # Whole problem fits in VMEM -> gridless call, 3 input DMAs (was 5).
    # TODO(synk): at replay-buffer batch sizes (256-1024) or larger hidden
    # dims, grid over batch tiles with two-pass BN (sum/sumsq accumulators) so
    # the batch axis can be "parallel" (2 TCs on v7x), a lane-dense (1, B)
    # value output, bf16 weights/activations on v6e/v7x, and tile sizes
    # re-derived against v7x's 64 MiB physical / 32 MiB scoped VMEM.
    return pl.pallas_call(
        make_critic_kernel(num_inputs, num_actions, h0, h1, offs),
        out_shape=jax.ShapeDtypeStruct((B, 1), jnp.float32),
        in_specs=[vmem] * 3,
        out_specs=vmem,
        cost_estimate=cost,
    )(inputs, actions, slab)


def fan_in_uniform_init(key, shape, fan_in=None):
    if fan_in is None:
        fan_in = shape[-1]
    w = 1.0 / np.sqrt(fan_in)
    return jax.random.uniform(key, shape, jnp.float32, minval=-w, maxval=w)


def init_critic_params(key, num_inputs, num_actions, hidden_size):
    h0, h1 = hidden_size
    ks = jax.random.split(key, 6)

    # PyTorch Linear weight is (out, in); store transposed (in, out).
    w1 = fan_in_uniform_init(ks[0], (h0, num_inputs)).T            # (num_inputs, h0)
    b1 = fan_in_uniform_init(ks[1], (1, h0))
    w2 = fan_in_uniform_init(ks[2], (h1, h0 + num_actions)).T      # (h0+A, h1)
    b2 = fan_in_uniform_init(ks[3], (1, h1))
    wv = jax.random.uniform(ks[4], (1, h1), jnp.float32,
                            minval=-WEIGHT_FINAL_INIT, maxval=WEIGHT_FINAL_INIT)
    bv = jax.random.uniform(ks[5], (1, 1), jnp.float32,
                            minval=-BIAS_FINAL_INIT, maxval=BIAS_FINAL_INIT)
    g1, be1 = jnp.ones((1, h0), jnp.float32), jnp.zeros((1, h0), jnp.float32)
    g2, be2 = jnp.ones((1, h1), jnp.float32), jnp.zeros((1, h1), jnp.float32)

    # Pack ALL kernel parameters into ONE sublane-aligned VMEM slab:
    # rows = [w1 | W2_h (activation rows of W2) | W2_a (action rows) | vectors].
    offs, n_rows = _slab_offsets(num_inputs, num_actions, h0, h1)
    w1_off, w2h_off, w2a_off, vec_off = offs
    width = max(h0, h1)
    slab = jnp.zeros((n_rows, width), jnp.float32)
    slab = slab.at[w1_off:w1_off + num_inputs, :h0].set(w1)
    slab = slab.at[w2h_off:w2h_off + h0, :h1].set(w2[:h0, :])
    slab = slab.at[w2a_off:w2a_off + num_actions, :h1].set(w2[h0:, :])
    slab = slab.at[vec_off + 0, :h0].set(g1[0])
    slab = slab.at[vec_off + 1, :h0].set(be1[0])
    slab = slab.at[vec_off + 2, :h1].set(g2[0])
    slab = slab.at[vec_off + 3, :h1].set(be2[0])
    slab = slab.at[vec_off + 4, :h1].set(wv[0])
    slab = slab.at[vec_off + 5, 0].set(bv[0, 0])

    return {
        # kernel input
        "slab": slab,
        # full PyTorch-layout params kept for the pure-JAX reference
        # (b1/b2 are algebraically dead in the kernel: they cancel inside BN)
        "w1": w1, "b1": b1, "w2": w2, "b2": b2, "g1": g1, "be1": be1,
        "g2": g2, "be2": be2, "wv": wv.T, "bv": bv,
    }


def critic_reference(inputs, actions, params):
    # Pure-JAX reference mirroring the PyTorch forward exactly (biases included).
    h = inputs @ params["w1"] + params["b1"]
    h = _bn_relu(h, params["g1"], params["be1"])
    h = jnp.concatenate([h, actions], axis=1) @ params["w2"] + params["b2"]
    h = _bn_relu(h, params["g2"], params["be2"])
    return h @ params["wv"] + params["bv"]


if __name__ == "__main__":
    B = 8               # batch (training-mode BatchNorm1d needs B > 1)
    num_inputs = 16     # state dim
    num_actions = 4     # action_space.shape[0]
    hidden_size = (32, 32)

    key = jax.random.PRNGKey(0)
    k_in, k_act, k_par = jax.random.split(key, 3)
    inputs = jax.random.normal(k_in, (B, num_inputs), jnp.float32)
    actions = jax.random.uniform(k_act, (B, num_actions), jnp.float32,
                                 minval=-1.0, maxval=1.0)
    params = init_critic_params(k_par, num_inputs, num_actions, hidden_size)

    v = critic_forward(inputs, actions, params, hidden_size)
    v = jax.block_until_ready(v)

    v_ref = critic_reference(inputs, actions, params)
    assert v.shape == (B, 1), v.shape
    np.testing.assert_allclose(np.asarray(v), np.asarray(v_ref), rtol=1e-4, atol=1e-5)

    print("KERNEL_OK")
</pallas_src>

<mosaic_0001>
module attributes {stable_mosaic.version = 11 : i64} {
  func.func @kernel(%arg0: memref<8x16xf32, #tpu.memory_space<vmem>>, %arg1: memref<8x4xf32, #tpu.memory_space<vmem>>, %arg2: memref<64x32xf32, #tpu.memory_space<vmem>>, %arg3: memref<8x1xf32, #tpu.memory_space<vmem>>) attributes {dimension_semantics = [], scalar_prefetch = 0 : i64, scratch_operands = 0 : i64, tpu.core_type = #tpu.core_type<tc>} {
    %c0 = arith.constant 0 : index
    %c0_0 = arith.constant 0 : index
    %0 = vector.load %arg2[%c0, %c0_0] : memref<64x32xf32, #tpu.memory_space<vmem>>, vector<16x32xf32>
    %c16 = arith.constant 16 : index
    %c0_1 = arith.constant 0 : index
    %1 = vector.load %arg2[%c16, %c0_1] : memref<64x32xf32, #tpu.memory_space<vmem>>, vector<32x32xf32>
    %c48 = arith.constant 48 : index
    %c0_2 = arith.constant 0 : index
    %2 = vector.load %arg2[%c48, %c0_2] : memref<64x32xf32, #tpu.memory_space<vmem>>, vector<4x32xf32>
    %c56 = arith.constant 56 : index
    %c0_3 = arith.constant 0 : index
    %3 = vector.load %arg2[%c56, %c0_3] : memref<64x32xf32, #tpu.memory_space<vmem>>, vector<1x32xf32>
    %c57 = arith.constant 57 : index
    %c0_4 = arith.constant 0 : index
    %4 = vector.load %arg2[%c57, %c0_4] : memref<64x32xf32, #tpu.memory_space<vmem>>, vector<1x32xf32>
    %c58 = arith.constant 58 : index
    %c0_5 = arith.constant 0 : index
    %5 = vector.load %arg2[%c58, %c0_5] : memref<64x32xf32, #tpu.memory_space<vmem>>, vector<1x32xf32>
    %c59 = arith.constant 59 : index
    %c0_6 = arith.constant 0 : index
    %6 = vector.load %arg2[%c59, %c0_6] : memref<64x32xf32, #tpu.memory_space<vmem>>, vector<1x32xf32>
    %c60 = arith.constant 60 : index
    %c0_7 = arith.constant 0 : index
    %7 = vector.load %arg2[%c60, %c0_7] : memref<64x32xf32, #tpu.memory_space<vmem>>, vector<1x32xf32>
    %c61 = arith.constant 61 : index
    %c0_8 = arith.constant 0 : index
    %8 = vector.load %arg2[%c61, %c0_8] : memref<64x32xf32, #tpu.memory_space<vmem>>, vector<1x1xf32>
    %c0_9 = arith.constant 0 : index
    %c0_10 = arith.constant 0 : index
    %9 = vector.load %arg0[%c0_9, %c0_10] : memref<8x16xf32, #tpu.memory_space<vmem>>, vector<8x16xf32>
    %cst = arith.constant dense<0.000000e+00> : vector<8x32xf32>
    %10 = tpu.matmul %9, %0, %cst {dimension_numbers = #tpu.dot_dimension_numbers<[1], [0], [0], [1], [0, 0, 1, 1], [], []>} : vector<8x16xf32>, vector<16x32xf32>, vector<8x32xf32> -> vector<8x32xf32>
    %cst_11 = arith.constant dense<0.000000e+00> : vector<32xf32>
    %11 = vector.multi_reduction <add>, %10, %cst_11 [0] : vector<8x32xf32> to vector<32xf32>
    %12 = vector.shape_cast %11 : vector<32xf32> to vector<1x32xf32>
    %cst_12 = arith.constant 8.000000e+00 : f32
    %13 = vector.broadcast %cst_12 : f32 to vector<1x32xf32>
    %14 = arith.divf %12, %13 : vector<1x32xf32>
    %15 = vector.broadcast %14 : vector<1x32xf32> to vector<8x32xf32>
    %16 = arith.subf %10, %15 : vector<8x32xf32>
    %17 = arith.mulf %16, %16 : vector<8x32xf32>
    %cst_13 = arith.constant dense<0.000000e+00> : vector<32xf32>
    %18 = vector.multi_reduction <add>, %17, %cst_13 [0] : vector<8x32xf32> to vector<32xf32>
    %19 = vector.shape_cast %18 : vector<32xf32> to vector<1x32xf32>
    %cst_14 = arith.constant 8.000000e+00 : f32
    %20 = vector.broadcast %cst_14 : f32 to vector<1x32xf32>
    %21 = arith.divf %19, %20 : vector<1x32xf32>
    %cst_15 = arith.constant 9.99999974E-6 : f32
    %22 = vector.broadcast %cst_15 : f32 to vector<1x32xf32>
    %23 = arith.addf %21, %22 : vector<1x32xf32>
    %24 = math.rsqrt %23 : vector<1x32xf32>
    %25 = arith.mulf %3, %24 : vector<1x32xf32>
    %26 = vector.broadcast %25 : vector<1x32xf32> to vector<8x32xf32>
    %27 = arith.mulf %16, %26 : vector<8x32xf32>
    %28 = vector.broadcast %4 : vector<1x32xf32> to vector<8x32xf32>
    %29 = arith.addf %27, %28 : vector<8x32xf32>
    %cst_16 = arith.constant 0.000000e+00 : f32
    %30 = vector.broadcast %cst_16 : f32 to vector<8x32xf32>
    %31 = arith.maximumf %29, %30 : vector<8x32xf32>
    %cst_17 = arith.constant dense<0.000000e+00> : vector<8x32xf32>
    %32 = tpu.matmul %31, %1, %cst_17 {dimension_numbers = #tpu.dot_dimension_numbers<[1], [0], [0], [1], [0, 0, 1, 1], [], []>} : vector<8x32xf32>, vector<32x32xf32>, vector<8x32xf32> -> vector<8x32xf32>
    %c0_18 = arith.constant 0 : index
    %c0_19 = arith.constant 0 : index
    %33 = vector.load %arg1[%c0_18, %c0_19] : memref<8x4xf32, #tpu.memory_space<vmem>>, vector<8x4xf32>
    %cst_20 = arith.constant dense<0.000000e+00> : vector<8x32xf32>
    %34 = tpu.matmul %33, %2, %cst_20 {dimension_numbers = #tpu.dot_dimension_numbers<[1], [0], [0], [1], [0, 0, 1, 1], [], []>} : vector<8x4xf32>, vector<4x32xf32>, vector<8x32xf32> -> vector<8x32xf32>
    %35 = arith.addf %32, %34 : vector<8x32xf32>
    %cst_21 = arith.constant dense<0.000000e+00> : vector<32xf32>
    %36 = vector.multi_reduction <add>, %35, %cst_21 [0] : vector<8x32xf32> to vector<32xf32>
    %37 = vector.shape_cast %36 : vector<32xf32> to vector<1x32xf32>
    %cst_22 = arith.constant 8.000000e+00 : f32
    %38 = vector.broadcast %cst_22 : f32 to vector<1x32xf32>
    %39 = arith.divf %37, %38 : vector<1x32xf32>
    %40 = vector.broadcast %39 : vector<1x32xf32> to vector<8x32xf32>
    %41 = arith.subf %35, %40 : vector<8x32xf32>
    %42 = arith.mulf %41, %41 : vector<8x32xf32>
    %cst_23 = arith.constant dense<0.000000e+00> : vector<32xf32>
    %43 = vector.multi_reduction <add>, %42, %cst_23 [0] : vector<8x32xf32> to vector<32xf32>
    %44 = vector.shape_cast %43 : vector<32xf32> to vector<1x32xf32>
    %cst_24 = arith.constant 8.000000e+00 : f32
    %45 = vector.broadcast %cst_24 : f32 to vector<1x32xf32>
    %46 = arith.divf %44, %45 : vector<1x32xf32>
    %cst_25 = arith.constant 9.99999974E-6 : f32
    %47 = vector.broadcast %cst_25 : f32 to vector<1x32xf32>
    %48 = arith.addf %46, %47 : vector<1x32xf32>
    %49 = math.rsqrt %48 : vector<1x32xf32>
    %50 = arith.mulf %5, %49 : vector<1x32xf32>
    %51 = vector.broadcast %50 : vector<1x32xf32> to vector<8x32xf32>
    %52 = arith.mulf %41, %51 : vector<8x32xf32>
    %53 = vector.broadcast %6 : vector<1x32xf32> to vector<8x32xf32>
    %54 = arith.addf %52, %53 : vector<8x32xf32>
    %cst_26 = arith.constant 0.000000e+00 : f32
    %55 = vector.broadcast %cst_26 : f32 to vector<8x32xf32>
    %56 = arith.maximumf %54, %55 : vector<8x32xf32>
    %57 = vector.broadcast %7 : vector<1x32xf32> to vector<8x32xf32>
    %58 = arith.mulf %56, %57 : vector<8x32xf32>
    %cst_27 = arith.constant dense<0.000000e+00> : vector<8xf32>
    %59 = vector.multi_reduction <add>, %58, %cst_27 [1] : vector<8x32xf32> to vector<8xf32>
    %60 = vector.shape_cast %59 : vector<8xf32> to vector<8x1xf32>
    %61 = vector.broadcast %8 : vector<1x1xf32> to vector<8x1xf32>
    %62 = arith.addf %60, %61 : vector<8x1xf32>
    %c0_28 = arith.constant 0 : index
    %c0_29 = arith.constant 0 : index
    %63 = vector.load %arg3[%c0_28, %c0_29] : memref<8x1xf32, #tpu.memory_space<vmem>>, vector<8x1xf32>
    tpu.vector_store %arg3[%c0_28, %c0_29], %62 {strides = array<i32>} : memref<8x1xf32, #tpu.memory_space<vmem>>, vector<8x1xf32>,
    return
  }
}

</mosaic_0001>

<bundles_post_ra>
// kernel: tpu_custom_call.1
= control target key start
LH: loop header
LB: loop body
LE: loop exit
PB: predicated region body
PF: predicated region fallthrough
CT: control target
= control target key end

     0   :  { %v386_v0 = vmov 0.0   ;;  %vm387_vm0 = vmmov 0   ;;  %vm28_vm1 = vcmask 130048   ;;  %vm141_vm2 = vcmask 1043456   ;;  %s462_s2 = inlined_call_operand.vmem [shape: f32[64,32], index: 2, kind: input, shape index: {}]   ;;  %s463_s0 = inlined_call_operand.vmem [shape: f32[8,16], index: 0, kind: input, shape index: {}]   ;;  %s464_s1 = inlined_call_operand.vmem [shape: f32[8,4], index: 1, kind: input, shape index: {}]   ;;  %s465_s3 = inlined_call_operand.vmem [shape: f32[8,1], index: 3, kind: output, shape index: {}]  }
   0x1   :  { %357 = vmatprep.subr.mxu0 %v386_v0  ;;  %v15_v1 = vld [vmem:[%s462_s2 + $0x8] sm:$0xff]  ;;  %v14_v2 = vld [vmem:[%s462_s2] sm:$0xff]  ;;  %361 = vmatprep.mubr.msk.f32.mxu0 %vm387_vm0, %v386_v0  ;;  %v20_v6 = vld [vmem:[%s462_s2 + $0x30] sm:$0xf]  ;;  %vm137_vm3 = vcmask 31744   ;;  %vm102_vm4 = vcmask 261120   ;;  %v125_v31 = vlaneseq }
   0x2   :  { %358 = vmatpush3.msra.mxu0 %v15_v1  ;;  %v27_v3 = vld [vmem:[%s463_s0] sm:$0xff]  ;;  %369 = vmatprep.subr.mxu1 %v386_v0  ;;  %v19_v4 = vld [vmem:[%s462_s2 + $0x28] sm:$0xff]  ;;  %v17_v7 = vld [vmem:[%s462_s2 + $0x18] sm:$0xff]  ;;  %vm333_vm5 = vcmask 7168  }
   0x3   :  { %359 = vmatprep.subr.mxu0 %v386_v0  ;;  %377 = vmatprep.mubr.msk.f32.mxu1 %vm387_vm0, %v386_v0  ;;  %v18_v5 = vld [vmem:[%s462_s2 + $0x20] sm:$0xff]  ;;  %v16_v9 = vld [vmem:[%s462_s2 + $0x10] sm:$0xff]  ;;  %v126_v32 = vshrl.u32 %v125_v31, 7  ;;  %v21_v33 = vld [vmem:[%s462_s2 + $0x38] sm:$0x1] }
   0x4   :  { %360 = vmatpush3.msra.mxu0 %v14_v2  ;;  %370 = vmatpush3.msra.mxu1 %v19_v4  ;;  %v136_v8 = vld [vmem:[%s464_s1] sm:$0xff]  ;;  %v340_v38 = vld [vmem:[%s462_s2 + $0x39] ss:$0 sm:$0xff]  ;;  %v23_v2 = vld [vmem:[%s462_s2 + $0x3a] sm:$0x1] }
   0x5   :  { %362 = vmatmul.mubr.msk.f32.vlgmr.msra.gmra.mxu0 %vm28_vm1, %v27_v3  ;;  %364 = vmatprep.subr.mxu0 %v386_v0  ;;  %v127_v34 = vsub.s32 0, %v126_v32 }
   0x6   :  { %366 = vmatprep.mubr.msk.f32.mxu0 %vm387_vm0, %v386_v0  ;;  %371 = vmatprep.subr.mxu1 %v386_v0 }
   0x7   :  { %372 = vmatpush3.msra.mxu1 %v18_v5  ;;  %365 = vmatpush3.msk.msra.mxu0 %vm141_vm2, %v20_v6  ;;  %v344_v6 = vld [vmem:[%s462_s2 + $0x3b] ss:$0 sm:$0xff] }
   0x8   :  { %373 = vmatprep.subr.mxu1 %v386_v0 }
   0x9   :  { %374 = vmatpush3.msra.mxu1 %v17_v7  ;;  %367 = vmatmul.mubr.msk.f32.vlgmr.msra.gmra.mxu0 %vm137_vm3, %v136_v8 }
   0xa   :  { %375 = vmatprep.subr.mxu1 %v386_v0 }
   0xb   :  { %376 = vmatpush3.msra.mxu1 %v16_v9  ;;  %v345_v9 = vld [vmem:[%s462_s2 + $0x3c] ss:$0 sm:$0xff] }
  0xc5   :  { %v98_v10 = vpop.f32.mrf.mxu0 }
  0xc6   :  { %v103_v11 = vsel %vm102_vm4, %v98_v10, 0.0 }
  0xc7   :  { %v104_v12 = vrot.slane %v103_v11, 4  ;;  %v363_v13 = vpop.f32.mrf.mxu0 }
  0xc8   :  { %v346_v13 = vld [vmem:[%s462_s2 + $0x3d] ss:$0 sm:$0xff] }
  0xc9   :  { %v105_v14 = vadd.f32 %v104_v12, %v103_v11  ;;  %v211_v42 = vpop.f32.mrf.mxu0 }
  0xcb   :  { %v106_v15 = vrot.slane %v105_v14, 2  ;;  %v368_v43 = vpop.f32.mrf.mxu0 }
  0xcd   :  { %v107_v16 = vadd.f32 %v106_v15, %v105_v14 }
  0xcf   :  { %v108_v17 = vrot.slane %v107_v16, 1 }
  0xd1   :  { %v109_v18 = vadd.f32 %v108_v17, %v107_v16 }
  0xd3   :  { %v111_v19 = vmul.f32 0.125, %v109_v18 }
  0xd5   :  { %v112_v20 = vsub.f32 %v98_v10, %v111_v19 }
  0xd7   :  { %v113_v21 = vmul.f32 %v112_v20, %v112_v20 }
  0xd9   :  { %v114_v22 = vsel %vm102_vm4, %v113_v21, 0.0 }
  0xda   :  { %v115_v23 = vrot.slane %v114_v22, 4 }
  0xdc   :  { %v116_v24 = vadd.f32 %v115_v23, %v114_v22 }
  0xde   :  { %v117_v25 = vrot.slane %v116_v24, 2 }
  0xe0   :  { %v118_v26 = vadd.f32 %v117_v25, %v116_v24 }
  0xe2   :  { %v119_v27 = vrot.slane %v118_v26, 1 }
  0xe4   :  { %v120_v28 = vadd.f32 %v119_v27, %v118_v26 }
  0xe6   :  { %v121_v29 = vmul.f32 0.125, %v120_v28 }
  0xe8   :  { %v122_v30 = vadd.f32 1e-05, %v121_v29 }
  0xea   :  { %382 = vrsqrt.f32 %v122_v30 }
  0xf7   :  { %v383_v35 = vpop.eup %382 }
  0xf8   :  { %v124_v36 = vmul.f32 %v383_v35, %v21_v33 }
  0xfa   :  { %v128_v37 = vrot.slane %v124_v36, %v127_v34 }
  0xfc   :  { %v129_v39 = vmul.f32 %v128_v37, %v112_v20 }
  0xfe   :  { %v134_v40 = vadd.f32 %v340_v38, %v129_v39 }
 0x100   :  { %v135_v41 = vmax.f32 %v134_v40, 0.0 }
 0x102   :  { %378 = vmatmul.mubr.msk.f32.vlgmr.msra.gmra.mxu1 %vm102_vm4, %v135_v41 }
 0x1c2   :  { %v284_v44 = vpop.f32.mrf.mxu1 }
 0x1c3   :  { %v285_v45 = vadd.f32 %v284_v44, %v211_v42 }
 0x1c4   :  { %v379_v46 = vpop.f32.mrf.mxu1 }
 0x1c5   :  { %v288_v47 = vsel %vm102_vm4, %v285_v45, 0.0 }
 0x1c6   :  { %v289_v48 = vrot.slane %v288_v47, 4 }
 0x1c8   :  { %v290_v49 = vadd.f32 %v289_v48, %v288_v47 }
 0x1ca   :  { %v291_v50 = vrot.slane %v290_v49, 2 }
 0x1cc   :  { %v292_v51 = vadd.f32 %v291_v50, %v290_v49 }
 0x1ce   :  { %v293_v52 = vrot.slane %v292_v51, 1 }
 0x1d0   :  { %v294_v53 = vadd.f32 %v293_v52, %v292_v51 }
 0x1d2   :  { %v295_v54 = vmul.f32 0.125, %v294_v53 }
 0x1d4   :  { %v296_v55 = vsub.f32 %v285_v45, %v295_v54 }
 0x1d6   :  { %v297_v56 = vmul.f32 %v296_v55, %v296_v55 }
 0x1d8   :  { %v298_v57 = vsel %vm102_vm4, %v297_v56, 0.0 }
 0x1d9   :  { %v299_v58 = vrot.slane %v298_v57, 4 }
 0x1db   :  { %v300_v59 = vadd.f32 %v299_v58, %v298_v57 }
 0x1dd   :  { %v301_v60 = vrot.slane %v300_v59, 2 }
 0x1df   :  { %v302_v61 = vadd.f32 %v301_v60, %v300_v59 }
 0x1e1   :  { %v303_v62 = vrot.slane %v302_v61, 1 }
 0x1e3   :  { %v304_v63 = vadd.f32 %v303_v62, %v302_v61 }
 0x1e5   :  { %v305_v0 = vmul.f32 0.125, %v304_v63 }
 0x1e7   :  { %v306_v1 = vadd.f32 1e-05, %v305_v0 }
 0x1e9   :  { %384 = vrsqrt.f32 %v306_v1 }
 0x1f6   :  { %v385_v3 = vpop.eup %384 }
 0x1f7   :  { %v308_v4 = vmul.f32 %v385_v3, %v23_v2 }
 0x1f9   :  { %v312_v5 = vrot.slane %v308_v4, %v127_v34 }
 0x1fb   :  { %v313_v7 = vmul.f32 %v312_v5, %v296_v55 }
 0x1fd   :  { %v318_v8 = vadd.f32 %v344_v6, %v313_v7 }
 0x1ff   :  { %v319_v10 = vmax.f32 %v318_v8, 0.0 }
 0x201   :  { %v324_v11 = vmul.f32 %v345_v9, %v319_v10 }
 0x203   :  { %v325_v12 = vsel %vm102_vm4, %v324_v11, 0.0 }
 0x204   :  { %326 = vadd.xlane.f32.xlu0 %v325_v12 }
 0x28d   :  { %v327_v14 = vpop.xlane.xlu0 %326 }
 0x28e   :  { %v332_v15 = vadd.f32 %v346_v13, %v327_v14 }
 0x290   :  { %334 = vst.msk [vmem:[%s465_s3] sm:$0xff] %vm333_vm5, %v332_v15 }

</bundles_post_ra>
